<compile_context>
chip_gen: v6e
topology: v6e:2x2x1
jax: 0.10.0
libtpu: 0.0.40
codegen_flags: <defaults>
</compile_context>

<pallas_src>
import jax
import jax.numpy as jnp
from jax.experimental import pallas as pl
from jax.experimental.pallas import tpu as pltpu


def se_gate_conv1x1_kernel(gate_ref, x_ref, w_ref, scale_ref, o_ref):
    # gate_ref : (1, C)  f32   SE gate logits for this batch element
    # x_ref    : (HW, C) f32   activations (channels-last, flattened spatial)
    # w_ref    : (C, C)  int8  quantized weight, layout (C_in, C_out)
    # scale_ref: (1, C)  f32   per-output-channel dequant scale
    # o_ref    : (HW, C) f32
    g = jax.nn.sigmoid(gate_ref[...])                      # EUP, f32
    xg = (x_ref[...] * g).astype(jnp.bfloat16)             # gate broadcast over rows
    w = w_ref[...].astype(jnp.bfloat16)                    # int8 -> bf16 is exact (|q|<=127)
    acc = jnp.dot(xg, w, preferred_element_type=jnp.float32)   # MXU, f32 accumulate
    o_ref[...] = acc * scale_ref[...]                      # per-out-channel rescale (VPU)


def prepare_conv1x1_weight_int8(weight_oihw):
    """One-time weight prep: (Co, Ci, 1, 1) f32 -> ((Ci, Co) int8, (1, Co) f32 scale)."""
    co, ci = weight_oihw.shape[0], weight_oihw.shape[1]
    w_t = jnp.transpose(weight_oihw.reshape(co, ci), (1, 0))          # (Ci, Co)
    max_abs = jnp.max(jnp.abs(w_t), axis=0, keepdims=True)            # (1, Co)
    scale = jnp.maximum(max_abs, 1e-12) / 127.0
    w_q = jnp.clip(jnp.round(w_t / scale), -127, 127).astype(jnp.int8)
    return w_q, scale.astype(jnp.float32)


def se_gate_conv1x1_nhwc(x_nhwc, gate_nc, w_q, w_scale):
    """Channels-last path: x (N,H,W,C) f32, gate (N,C) f32, weight (C,C) int8 + scale."""
    N, H, W, C = x_nhwc.shape
    ci, co = w_q.shape
    HW = H * W

    x_flat = x_nhwc.reshape(N, HW, C)       # contiguous reshape, no copy, no padding
    gate3 = gate_nc.reshape(N, 1, C)

    cost = pl.CostEstimate(
        flops=2 * N * HW * ci * co,
        transcendentals=N * ci,
        bytes_accessed=(x_flat.size * 4 + gate3.size * 4 + w_q.size * 1
                        + w_scale.size * 4 + N * HW * co * 4),
    )

    out = pl.pallas_call(
        se_gate_conv1x1_kernel,
        out_shape=jax.ShapeDtypeStruct((N, HW, co), x_nhwc.dtype),
        grid_spec=pl.GridSpec(
            grid=(N,),                                              # == (1,) at module shapes
            in_specs=[
                pl.BlockSpec((None, 1, C), lambda n: (n, 0, 0)),    # per-batch SE gate
                pl.BlockSpec((None, HW, C), lambda n: (n, 0, 0)),   # full-array block (49,440)
                pl.BlockSpec((ci, co), lambda n: (0, 0)),           # constant int8 weight
                pl.BlockSpec((1, co), lambda n: (0, 0)),            # per-channel scale
            ],
            out_specs=pl.BlockSpec((None, HW, co), lambda n: (n, 0, 0)),
        ),
        compiler_params=pltpu.CompilerParams(
            dimension_semantics=("parallel",),
        ),
        cost_estimate=cost,
    )(gate3, x_flat, w_q, w_scale)

    return out.reshape(N, H, W, co)


@jax.jit
def se_gate_conv1x1_nchw(x_nchw, gate_nchw, w_q, w_scale):
    """PyTorch-convention wrapper (NCHW in/out). The two layout transposes here cost more
    than the kernel body; keep activations channels-last between layers and call
    se_gate_conv1x1_nhwc directly for best end-to-end latency."""
    N, C, H, W = x_nchw.shape
    x_nhwc = jnp.transpose(x_nchw, (0, 2, 3, 1))
    gate_nc = gate_nchw.reshape(N, C)
    out_nhwc = se_gate_conv1x1_nhwc(x_nhwc, gate_nc, w_q, w_scale)
    return jnp.transpose(out_nhwc, (0, 3, 1, 2))


if __name__ == "__main__":
    key = jax.random.PRNGKey(0)
    k1, k2, k3 = jax.random.split(key, 3)

    # Shapes implied by the module: x177=(1,440,7,7), x181=(1,440,1,1),
    # conv2d59: 440 -> 440, kernel (1,1), no bias.
    N, C, H, W = 1, 440, 7, 7
    x177 = jax.random.normal(k1, (N, C, H, W), dtype=jnp.float32)
    x181 = jax.random.normal(k2, (N, C, 1, 1), dtype=jnp.float32)
    weight = (jax.random.normal(k3, (C, C, 1, 1), dtype=jnp.float32)
              * (1.0 / jnp.sqrt(jnp.float32(C))))

    # One-time (constant-foldable) weight prep: transpose + per-out-channel int8 quant.
    w_q, w_scale = prepare_conv1x1_weight_int8(weight)
    w_q = jax.block_until_ready(w_q)
    w_scale = jax.block_until_ready(w_scale)

    out = se_gate_conv1x1_nchw(x177, x181, w_q, w_scale)
    out = jax.block_until_ready(out)

    # Pure-JAX references.
    gated = jax.nn.sigmoid(x181) * x177                               # (N,C,H,W)
    w2d = weight.reshape(C, C)
    ref_f32 = jnp.einsum("nchw,oc->nohw", gated, w2d)
    # Reference matched to the kernel's quantized weight (w_deq is (Ci, Co)).
    w_deq = w_q.astype(jnp.float32) * w_scale
    ref_quant = jnp.einsum("nchw,co->nohw", gated, w_deq)

    assert out.shape == (N, C, H, W)
    assert jnp.allclose(out, ref_quant, atol=2e-2, rtol=2e-2), (
        float(jnp.max(jnp.abs(out - ref_quant))))
    assert jnp.allclose(out, ref_f32, atol=5e-2, rtol=5e-2), (
        float(jnp.max(jnp.abs(out - ref_f32))))

    print("KERNEL_OK")
</pallas_src>

<mosaic_0001>
module attributes {stable_mosaic.version = 11 : i64} {
  func.func @se_gate_conv1x1_kernel(%arg0: i32, %arg1: memref<1x1x440xf32, #tpu.memory_space<vmem>>, %arg2: memref<1x49x440xf32, #tpu.memory_space<vmem>>, %arg3: memref<440x440xi8, #tpu.memory_space<vmem>>, %arg4: memref<1x440xf32, #tpu.memory_space<vmem>>, %arg5: memref<1x49x440xf32, #tpu.memory_space<vmem>>) attributes {dimension_semantics = [#tpu.dimension_semantics<parallel>], iteration_bounds = array<i64: 1>, scalar_prefetch = 0 : i64, scratch_operands = 0 : i64, tpu.core_type = #tpu.core_type<tc>, window_params = [{transform_indices = @transform_0, window_bounds = array<i64: 1, 1, 440>}, {transform_indices = @transform_1, window_bounds = array<i64: 1, 49, 440>}, {pipeline_mode = #tpu.pipeline_mode<synchronous>, transform_indices = @transform_2, window_bounds = array<i64: 440, 440>}, {pipeline_mode = #tpu.pipeline_mode<synchronous>, transform_indices = @transform_3, window_bounds = array<i64: 1, 440>}, {transform_indices = @transform_4, window_bounds = array<i64: 1, 49, 440>}]} {
    %c0 = arith.constant 0 : index
    %c0_0 = arith.constant 0 : index
    %c0_1 = arith.constant 0 : index
    %0 = vector.load %arg1[%c0, %c0_0, %c0_1] : memref<1x1x440xf32, #tpu.memory_space<vmem>>, vector<1x1x440xf32>
    %1 = vector.shape_cast %0 : vector<1x1x440xf32> to vector<1x440xf32>
    %2 = arith.negf %1 : vector<1x440xf32>
    %3 = math.exp %2 : vector<1x440xf32>
    %cst = arith.constant 1.000000e+00 : f32
    %4 = vector.broadcast %cst : f32 to vector<1x440xf32>
    %5 = arith.addf %4, %3 : vector<1x440xf32>
    %6 = arith.divf %4, %5 : vector<1x440xf32>
    %c0_2 = arith.constant 0 : index
    %c0_3 = arith.constant 0 : index
    %c0_4 = arith.constant 0 : index
    %7 = vector.load %arg2[%c0_2, %c0_3, %c0_4] : memref<1x49x440xf32, #tpu.memory_space<vmem>>, vector<1x49x440xf32>
    %8 = vector.shape_cast %7 : vector<1x49x440xf32> to vector<49x440xf32>
    %9 = vector.broadcast %6 : vector<1x440xf32> to vector<49x440xf32>
    %10 = arith.mulf %8, %9 : vector<49x440xf32>
    %11 = arith.truncf %10 : vector<49x440xf32> to vector<49x440xbf16>
    %c0_5 = arith.constant 0 : index
    %c0_6 = arith.constant 0 : index
    %12 = vector.load %arg3[%c0_5, %c0_6] : memref<440x440xi8, #tpu.memory_space<vmem>>, vector<440x440xi8>
    %13 = arith.sitofp %12 : vector<440x440xi8> to vector<440x440xbf16>
    %cst_7 = arith.constant dense<0.000000e+00> : vector<49x440xf32>
    %14 = tpu.matmul %11, %13, %cst_7 {dimension_numbers = #tpu.dot_dimension_numbers<[1], [0], [0], [1], [0, 0, 1, 1], [], []>} : vector<49x440xbf16>, vector<440x440xbf16>, vector<49x440xf32> -> vector<49x440xf32>
    %c0_8 = arith.constant 0 : index
    %c0_9 = arith.constant 0 : index
    %15 = vector.load %arg4[%c0_8, %c0_9] : memref<1x440xf32, #tpu.memory_space<vmem>>, vector<1x440xf32>
    %16 = vector.broadcast %15 : vector<1x440xf32> to vector<49x440xf32>
    %17 = arith.mulf %14, %16 : vector<49x440xf32>
    %c0_10 = arith.constant 0 : index
    %c0_11 = arith.constant 0 : index
    %c0_12 = arith.constant 0 : index
    %18 = vector.load %arg5[%c0_10, %c0_11, %c0_12] : memref<1x49x440xf32, #tpu.memory_space<vmem>>, vector<1x49x440xf32>
    %19 = vector.shape_cast %18 : vector<1x49x440xf32> to vector<49x440xf32>
    %20 = vector.shape_cast %17 : vector<49x440xf32> to vector<1x49x440xf32>
    tpu.vector_store %arg5[%c0_10, %c0_11, %c0_12], %20 {strides = array<i32>} : memref<1x49x440xf32, #tpu.memory_space<vmem>>, vector<1x49x440xf32>,
    return
  }
  func.func @transform_0(%arg0: i32) -> (i32, i32, i32) {
    %c0_i32 = arith.constant 0 : i32
    %c0_i32_0 = arith.constant 0 : i32
    %c0_i32_1 = arith.constant 0 : i32
    return %arg0, %c0_i32, %c0_i32_0 : i32, i32, i32
  }
  func.func @transform_1(%arg0: i32) -> (i32, i32, i32) {
    %c0_i32 = arith.constant 0 : i32
    %c0_i32_0 = arith.constant 0 : i32
    %c0_i32_1 = arith.constant 0 : i32
    return %arg0, %c0_i32, %c0_i32_0 : i32, i32, i32
  }
  func.func @transform_2(%arg0: i32) -> (i32, i32) {
    %c0_i32 = arith.constant 0 : i32
    %c0_i32_0 = arith.constant 0 : i32
    %c0_i32_1 = arith.constant 0 : i32
    return %c0_i32, %c0_i32_0 : i32, i32
  }
  func.func @transform_3(%arg0: i32) -> (i32, i32) {
    %c0_i32 = arith.constant 0 : i32
    %c0_i32_0 = arith.constant 0 : i32
    %c0_i32_1 = arith.constant 0 : i32
    return %c0_i32, %c0_i32_0 : i32, i32
  }
  func.func @transform_4(%arg0: i32) -> (i32, i32, i32) {
    %c0_i32 = arith.constant 0 : i32
    %c0_i32_0 = arith.constant 0 : i32
    %c0_i32_1 = arith.constant 0 : i32
    return %arg0, %c0_i32, %c0_i32_0 : i32, i32, i32
  }
}

</mosaic_0001>

<bundles_post_ra>
// kernel: se_gate_conv1x1_nchw.1
= control target key start
LH: loop header
LB: loop body
LE: loop exit
PB: predicated region body
PF: predicated region fallthrough
CT: control target
= control target key end

     0   :  { %9 = vsyncpa [#allocation3], 0  ;;  %s1393_s15 = smov [#allocation2]   ;;  %s2016_s0 = inlined_call_operand.vmem [shape: f32[1,1,440], index: 0, kind: input, shape index: {}]   ;;  %s2017_s1 = inlined_call_operand.vmem [shape: f32[1,49,440], index: 1, kind: input, shape index: {}]   ;;  %s2018_s2 = inlined_call_operand.hbm [shape: s8[440,440], index: 2, kind: input, shape index: {}]   ;;  %s2019_s3 = inlined_call_operand.vmem [shape: f32[1,440], index: 3, kind: input, shape index: {}]   ;;  %s2020_s4 = inlined_call_operand.vmem [shape: f32[1,49,440], index: 4, kind: output, shape index: {}]  }
   0x1   :  { %s19_s16 = sshll.u32 %s1393_s15, 4  ;;  %s20_s16 = int_to_ptr.vmem [resolvable:$true] %s19_s16 }
   0x2   :  { %s1379_s17 = scalar_lea.vmem %s20_s16, 7040  ;;  %p1384_p1 = scmp.lt.s32.totalorder %s20_s16, %s20_s16 }
   0x3   :  { %p1380_p0 = scmp.ne.s32.totalorder %s20_s16, %s1379_s17  ;;  %p1385_p2 = scmp.lt.s32.totalorder %s1379_s17, %s1379_s17 }
   0x5   :  { %p1386_p3 = por %p1385_p2, %p1384_p1 }
   0x7   :  { %p1387_p4 = pnand %p1386_p3, %p1380_p0 }
   0x9   :  { %1390 = shalt.err (!%p1387_p4)
}
   0xa   :  { %s1394_s18 = smov 128   ;;  %s1395_s19 = smov 8  }
   0xb   :  { %25 = dma.hbm_to_vmem [thread:$0]  %s2018_s2, 7040, %s20_s16, [#allocation3], %s1394_s18, %s1394_s18, %s1395_s19  }
   0xc   :  { %1391 = dma.done.wait [#allocation3], 7040  }
   0xd   :  { %1392 = vsyncadd [#allocation3], 4294960256  ;;  %v1424_v0 = vld [vmem:[#allocation2 + $0x70] sm:$0xff]  ;;  %v1426_v1 = vld [vmem:[#allocation2 + $0x78] sm:$0xff]  ;;  %vm860_vm0 = vcmask 1043456   ;;  %vm847_vm1 = vcmask 457728  }
   0xe   :  { %v1428_v2 = vld [vmem:[#allocation2 + $0x170] sm:$0xff]  ;;  %v215_v3 = vunpack.c.l.s8.bf16 %v1424_v0  ;;  %v217_v4 = vunpack.c.l.s8.bf16 %v1426_v1  ;;  %v1432_v5 = vld [vmem:[#allocation2 + $0x178] sm:$0xff]  ;;  %v1434_v6 = vld [vmem:[#allocation2 + $0x60] sm:$0xff]  ;;  %vm1234_vm2 = vcmask 450560  }
   0xf   :  { %v1436_v7 = vld [vmem:[#allocation2 + $0x68] sm:$0xff]  ;;  %v279_v8 = vunpack.c.l.s8.bf16 %v1428_v2  ;;  %v281_v9 = vunpack.c.l.s8.bf16 %v1432_v5  ;;  %v1440_v10 = vld [vmem:[#allocation2 + $0x160] sm:$0xff]  ;;  %v1444_v12 = vld [vmem:[#allocation2 + $0x50] sm:$0xff]  ;;  %v211_v15 = vunpack.c.l.s8.bf16 %v1434_v6 }
  0x10   :  { %v1442_v11 = vld [vmem:[#allocation2 + $0x168] sm:$0xff]  ;;  %v1271_v13 = vcombine.high %v215_v3, %v217_v4  ;;  %v1270_v14 = vcombine.low %v215_v3, %v217_v4  ;;  %v1447_v16 = vld [vmem:[#allocation2 + $0x58] sm:$0xff]  ;;  %v1449_v17 = vld [vmem:[#allocation2 + $0x150] sm:$0xff]  ;;  %v213_v21 = vunpack.c.l.s8.bf16 %v1436_v7  ;;  %v275_v22 = vunpack.c.l.s8.bf16 %v1440_v10 }
  0x11   :  { %v1451_v18 = vld [vmem:[#allocation2 + $0x158] sm:$0xff]  ;;  %v1335_v19 = vcombine.high %v279_v8, %v281_v9  ;;  %v1334_v20 = vcombine.low %v279_v8, %v281_v9  ;;  %v277_v23 = vunpack.c.l.s8.bf16 %v1442_v11  ;;  %v207_v24 = vunpack.c.l.s8.bf16 %v1444_v12  ;;  %v1458_v26 = vld [vmem:[#allocation2 + $0x40] sm:$0xff]  ;;  %v1460_v27 = vld [vmem:[#allocation2 + $0x48] sm:$0xff] }
  0x12   :  { %873 = vmatprep.subr.bf16.mxu0 %v1271_v13  ;;  %v209_v25 = vunpack.c.l.s8.bf16 %v1447_v16  ;;  %v1267_v28 = vcombine.high %v211_v15, %v213_v21  ;;  %v1266_v29 = vcombine.low %v211_v15, %v213_v21  ;;  %v271_v30 = vunpack.c.l.s8.bf16 %v1449_v17  ;;  %v1464_v32 = vld [vmem:[#allocation2 + $0x140] sm:$0xff]  ;;  %v1466_v33 = vld [vmem:[#allocation2 + $0x148] sm:$0xff]  ;;  %v1470_v40 = vld [vmem:[#allocation2 + $0x30] sm:$0xff] }
  0x13   :  { %944 = vmatprep.subr.bf16.mxu1 %v1335_v19  ;;  %874 = vmatpush1.bf16.msra.mxu0 %v1270_v14  ;;  %v273_v31 = vunpack.c.l.s8.bf16 %v1451_v18  ;;  %v1331_v34 = vcombine.high %v275_v22, %v277_v23  ;;  %v1330_v35 = vcombine.low %v275_v22, %v277_v23  ;;  %v203_v38 = vunpack.c.l.s8.bf16 %v1458_v26  ;;  %v1472_v41 = vld [vmem:[#allocation2 + $0x38] sm:$0xff]  ;;  %v1476_v44 = vld [vmem:[#allocation2 + $0x130] sm:$0xff]  ;;  %v1484_v54 = vld [vmem:[#allocation2 + $0x20] sm:$0xff] }
  0x14   :  { %945 = vmatpush1.bf16.msra.mxu1 %v1334_v20  ;;  %v1263_v36 = vcombine.high %v207_v24, %v209_v25  ;;  %875 = vmatprep.subr.bf16.mxu0 %v1267_v28  ;;  %v205_v39 = vunpack.c.l.s8.bf16 %v1460_v27  ;;  %v267_v42 = vunpack.c.l.s8.bf16 %v1464_v32  ;;  %v269_v43 = vunpack.c.l.s8.bf16 %v1466_v33  ;;  %v1478_v45 = vld [vmem:[#allocation2 + $0x138] sm:$0xff]  ;;  %v1486_v55 = vld [vmem:[#allocation2 + $0x28] sm:$0xff]  ;;  %v1488_v56 = vld [vmem:[#allocation2 + $0x120] sm:$0xff] }
  0x15   :  { %v1327_v37 = vcombine.high %v271_v30, %v273_v31  ;;  %946 = vmatprep.subr.bf16.mxu1 %v1331_v34  ;;  %v1262_v46 = vcombine.low %v207_v24, %v209_v25  ;;  %v1326_v47 = vcombine.low %v271_v30, %v273_v31  ;;  %v199_v49 = vunpack.c.l.s8.bf16 %v1470_v40  ;;  %v1490_v57 = vld [vmem:[#allocation2 + $0x128] sm:$0xff]  ;;  %v1496_v8 = vld [vmem:[#allocation2 + $0x10] sm:$0xff]  ;;  %v1498_v9 = vld [vmem:[#allocation2 + $0x18] sm:$0xff] }
  0x16   :  { %v1259_v48 = vcombine.high %v203_v38, %v205_v39  ;;  %v201_v50 = vunpack.c.l.s8.bf16 %v1472_v41  ;;  %v1323_v51 = vcombine.high %v267_v42, %v269_v43  ;;  %v263_v52 = vunpack.c.l.s8.bf16 %v1476_v44  ;;  %v1500_v13 = vld [vmem:[#allocation2 + $0x110] sm:$0xff]  ;;  %v1502_v14 = vld [vmem:[#allocation2 + $0x118] sm:$0xff]  ;;  %v1508_v28 = vld [vmem:[#allocation2] sm:$0xff] }
  0x17   :  { %876 = vmatpush1.bf16.msra.mxu0 %v1266_v29  ;;  %v265_v53 = vunpack.c.l.s8.bf16 %v1478_v45  ;;  %v1258_v58 = vcombine.low %v203_v38, %v205_v39  ;;  %v1322_v59 = vcombine.low %v267_v42, %v269_v43  ;;  %v195_v61 = vunpack.c.l.s8.bf16 %v1484_v54  ;;  %v1510_v29 = vld [vmem:[#allocation2 + $0x8] sm:$0xff]  ;;  %v1512_v30 = vld [vmem:[#allocation2 + $0x100] sm:$0xff] }
  0x18   :  { %947 = vmatpush1.bf16.msra.mxu1 %v1330_v35  ;;  %877 = vmatprep.subr.bf16.mxu0 %v1263_v36  ;;  %v1255_v60 = vcombine.high %v199_v49, %v201_v50  ;;  %v197_v62 = vunpack.c.l.s8.bf16 %v1486_v55  ;;  %v259_v3 = vunpack.c.l.s8.bf16 %v1488_v56  ;;  %v261_v4 = vunpack.c.l.s8.bf16 %v1490_v57  ;;  %v1514_v31 = vld [vmem:[#allocation2 + $0x108] sm:$0xff]  ;;  %v32_v39 = vld [vmem:[%s2016_s0] sm:$0xf] }
  0x19   :  { %948 = vmatprep.subr.bf16.mxu1 %v1327_v37  ;;  %v1319_v63 = vcombine.high %v263_v52, %v265_v53  ;;  %v1254_v15 = vcombine.low %v199_v49, %v201_v50  ;;  %v1318_v19 = vcombine.low %v263_v52, %v265_v53  ;;  %v191_v21 = vunpack.c.l.s8.bf16 %v1496_v8  ;;  %v1527_v49 = vld [vmem:[#allocation2 + $0x1b0] sm:$0xff] }
  0x1a   :  { %v1251_v20 = vcombine.high %v195_v61, %v197_v62  ;;  %v193_v22 = vunpack.c.l.s8.bf16 %v1498_v9  ;;  %v1315_v23 = vcombine.high %v259_v3, %v261_v4  ;;  %v255_v24 = vunpack.c.l.s8.bf16 %v1500_v13 }
  0x1b   :  { %878 = vmatpush1.bf16.msra.mxu0 %v1262_v46  ;;  %v257_v25 = vunpack.c.l.s8.bf16 %v1502_v14  ;;  %v1250_v34 = vcombine.low %v195_v61, %v197_v62  ;;  %v1314_v35 = vcombine.low %v259_v3, %v261_v4  ;;  %v187_v37 = vunpack.c.l.s8.bf16 %v1508_v28  ;;  %v1532_v62 = vld [vmem:[#allocation2 + $0xe0] sm:$0xff]  ;;  %v1538_v4 = vld [vmem:[#allocation2 + $0x1a8] sm:$0xff] }
  0x1c   :  { %949 = vmatpush1.bf16.msra.mxu1 %v1326_v47  ;;  %879 = vmatprep.subr.bf16.mxu0 %v1259_v48  ;;  %v1247_v36 = vcombine.high %v191_v21, %v193_v22  ;;  %v189_v38 = vunpack.c.l.s8.bf16 %v1510_v29  ;;  %v251_v43 = vunpack.c.l.s8.bf16 %v1512_v30  ;;  %v253_v46 = vunpack.c.l.s8.bf16 %v1514_v31  ;;  %v1523_v47 = vld [vmem:[#allocation2 + $0xf0] sm:$0xff]  ;;  %v1525_v48 = vld [vmem:[#allocation2 + $0xf8] sm:$0xff]  ;;  %v1536_v3 = vld [vmem:[#allocation2 + $0x1a0] sm:$0xff]  ;;  %2042 = vst [vmem:[#allocation6_spill] sm:$0xff] %v1538_v4 }
  0x1d   :  { %950 = vmatprep.subr.bf16.mxu1 %v1323_v51  ;;  %v1311_v42 = vcombine.high %v255_v24, %v257_v25  ;;  %v1246_v50 = vcombine.low %v191_v21, %v193_v22  ;;  %v1241_v51 = vmul.f32 -1.442695, %v32_v39  ;;  %v1310_v52 = vcombine.low %v255_v24, %v257_v25  ;;  %2041 = vst [vmem:[#allocation5_spill] sm:$0xff] %v1536_v3 }
  0x1e   :  { %v1243_v53 = vcombine.high %v187_v37, %v189_v38  ;;  %v295_v61 = vunpack.c.l.s8.bf16 %v1527_v49  ;;  %v243_v21 = vunpack.c.l.s8.bf16 %v1532_v62  ;;  %v291_v25 = vunpack.c.l.s8.bf16 %v1536_v3  ;;  %v1570_v3 = vld [vmem:[#allocation2 + $0xb0] sm:$0xff] }
  0x1f   :  { %880 = vmatpush1.bf16.msra.mxu0 %v1258_v58  ;;  %v247_v58 = vunpack.c.l.s8.bf16 %v1523_v47  ;;  %1367 = vpow2.f32 %v1241_v51  ;;  %2051 = vst [vmem:[#allocation15_spill] sm:$0xff] %v1570_v3 }
  0x20   :  { %951 = vmatpush1.bf16.msra.mxu1 %v1322_v59  ;;  %881 = vmatprep.subr.bf16.mxu0 %v1255_v60  ;;  %v249_v59 = vunpack.c.l.s8.bf16 %v1525_v48  ;;  %v1307_v60 = vcombine.high %v251_v43, %v253_v46  ;;  %v1350_v24 = vcombine.low %v295_v61, %v295_v61 }
  0x21   :  { %952 = vmatprep.subr.bf16.mxu1 %v1319_v63  ;;  %v1534_v63 = vld [vmem:[#allocation2 + $0xe8] sm:$0xff] }
  0x22   :  { %v245_v22 = vunpack.c.l.s8.bf16 %v1534_v63  ;;  %v1302_v39 = vcombine.low %v247_v58, %v249_v59 }
  0x23   :  { %882 = vmatpush1.bf16.msra.mxu0 %v1254_v15  ;;  %v1242_v15 = vcombine.low %v187_v37, %v189_v38  ;;  %v1548_v37 = vld [vmem:[#allocation2 + $0x190] sm:$0xff]  ;;  %v1550_v38 = vld [vmem:[#allocation2 + $0x198] sm:$0xff] }
  0x24   :  { %953 = vmatpush1.bf16.msra.mxu1 %v1318_v19  ;;  %883 = vmatprep.subr.bf16.mxu0 %v1251_v20  ;;  %v1306_v19 = vcombine.low %v251_v43, %v253_v46  ;;  %v1303_v20 = vcombine.high %v247_v58, %v249_v59  ;;  %2045 = vst [vmem:[#allocation9_spill] sm:$0xff] %v1548_v37  ;;  %2046 = vst [vmem:[#allocation10_spill] sm:$0xff] %v1550_v38  ;;  %v1562_v58 = vld [vmem:[#allocation2 + $0x180] sm:$0xff]  ;;  %v1564_v59 = vld [vmem:[#allocation2 + $0x188] sm:$0xff] }
  0x25   :  { %954 = vmatprep.subr.bf16.mxu1 %v1315_v23  ;;  %v1351_v23 = vcombine.high %v295_v61, %v295_v61  ;;  %v1560_v61 = vld [vmem:[#allocation2 + $0xc8] sm:$0xff]  ;;  %2049 = vst [vmem:[#allocation13_spill] sm:$0xff] %v1562_v58  ;;  %2050 = vst [vmem:[#allocation14_spill] sm:$0xff] %v1564_v59 }
  0x26   :  { %2048 = vst [vmem:[#allocation12_spill] sm:$0xff] %v1560_v61 }
  0x27   :  { %884 = vmatpush1.bf16.msra.mxu0 %v1250_v34  ;;  %v293_v34 = vunpack.c.l.s8.bf16 %v1538_v4  ;;  %v285_v4 = vunpack.c.l.s8.bf16 %v1564_v59  ;;  %v218_v59 = vunpack.c.h.s8.bf16 %v1426_v1 }
  0x28   :  { %955 = vmatpush1.bf16.msra.mxu1 %v1314_v35  ;;  %885 = vmatprep.subr.bf16.mxu0 %v1247_v36  ;;  %v1544_v35 = vld [vmem:[#allocation2 + $0xd0] sm:$0xff]  ;;  %v1546_v36 = vld [vmem:[#allocation2 + $0xd8] sm:$0xff] }
  0x29   :  { %956 = vmatprep.subr.bf16.mxu1 %v1311_v42  ;;  %2043 = vst [vmem:[#allocation7_spill] sm:$0xff] %v1544_v35  ;;  %2044 = vst [vmem:[#allocation8_spill] sm:$0xff] %v1546_v36  ;;  %v1299_v42 = vcombine.high %v243_v21, %v245_v22  ;;  %v239_v43 = vunpack.c.l.s8.bf16 %v1544_v35  ;;  %v241_v46 = vunpack.c.l.s8.bf16 %v1546_v36  ;;  %v1347_v51 = vcombine.high %v291_v25, %v293_v34  ;;  %v1572_v36 = vld [vmem:[#allocation2 + $0xb8] sm:$0xff] }
  0x2a   :  { %2052 = vst [vmem:[#allocation16_spill] sm:$0xff] %v1572_v36 }
  0x2b   :  { %886 = vmatpush1.bf16.msra.mxu0 %v1246_v50  ;;  %v862_v50 = vsel %vm860_vm0, %v1350_v24, 0  ;;  %v237_v24 = vunpack.c.l.s8.bf16 %v1560_v61  ;;  %v1578_v61 = vld [vmem:[#allocation2 + $0xa0] sm:$0xff] }
  0x2c   :  { %957 = vmatpush1.bf16.msra.mxu1 %v1310_v52  ;;  %887 = vmatprep.subr.bf16.mxu0 %v1243_v53  ;;  %v287_v52 = vunpack.c.l.s8.bf16 %v1548_v37  ;;  %v289_v53 = vunpack.c.l.s8.bf16 %v1550_v38  ;;  %v283_v37 = vunpack.c.l.s8.bf16 %v1562_v58  ;;  %2053 = vst [vmem:[#allocation17_spill] sm:$0xff] %v1578_v61 }
  0x2d   :  { %958 = vmatprep.subr.bf16.mxu1 %v1307_v60  ;;  %v1558_v60 = vld [vmem:[#allocation2 + $0xc0] sm:$0xff] }
  0x2e   :  { %2047 = vst [vmem:[#allocation11_spill] sm:$0xff] %v1558_v60  ;;  %v1343_v38 = vcombine.high %v287_v52, %v289_v53  ;;  %v1339_v58 = vcombine.high %v283_v37, %v285_v4 }
  0x2f   :  { %888 = vmatpush1.bf16.msra.mxu0 %v1242_v15  ;;  %v1298_v15 = vcombine.low %v243_v21, %v245_v22  ;;  %v1294_v21 = vcombine.low %v239_v43, %v241_v46 }
  0x30   :  { %959 = vmatpush1.bf16.msra.mxu1 %v1306_v19  ;;  %889 = vmatprep.subr.bf16.mxu0 %v1303_v20  ;;  %v1346_v19 = vcombine.low %v291_v25, %v293_v34  ;;  %v1295_v20 = vcombine.high %v239_v43, %v241_v46  ;;  %v1342_v25 = vcombine.low %v287_v52, %v289_v53  ;;  %v68_v43 = vlaneseq }
  0x31   :  { %1354 = vmatprep.subr.msk.bf16.mxu1 %vm860_vm0, %v1351_v23  ;;  %v235_v23 = vunpack.c.l.s8.bf16 %v1558_v60  ;;  %v1338_v52 = vcombine.low %v283_v37, %v285_v4 }
  0x33   :  { %890 = vmatpush2.bf16.msra.mxu0 %v1302_v39  ;;  %v1368_v39 = vpop.eup %1367  ;;  %v1291_v34 = vcombine.high %v235_v23, %v237_v24  ;;  %v1290_v46 = vcombine.low %v235_v23, %v237_v24  ;;  %v1592_v24 = vld [vmem:[#allocation2 + $0x80] sm:$0xff] }
  0x34   :  { %969 = vmatpush2.bf16.msra.mxu1 %v862_v50  ;;  %891 = vmatprep.subr.bf16.mxu0 %v1299_v42  ;;  %v36_v22 = vadd.f32 1.0, %v1368_v39  ;;  %v231_v42 = vunpack.c.l.s8.bf16 %v1570_v3  ;;  %v233_v50 = vunpack.c.l.s8.bf16 %v1572_v36  ;;  %v1588_v39 = vshrl.u32 %v68_v43, 7  ;;  %2058 = vst [vmem:[#allocation22_spill] sm:$0xff] %v1592_v24 }
  0x35   :  { %970 = vmatprep.subr.bf16.mxu1 %v1347_v51  ;;  %v216_v51 = vunpack.c.h.s8.bf16 %v1424_v0 }
  0x36   :  { %1369 = vrcp.f32 %v36_v22  ;;  %v1287_v53 = vcombine.high %v231_v42, %v233_v50  ;;  %2057 = vst [vmem:[#allocation21_spill] sm:$0xff] %v1588_v39  ;;  %v1286_v22 = vcombine.low %v231_v42, %v233_v50  ;;  %v2062_v43 = vsub.s32 1, %v1588_v39 }
  0x37   :  { %892 = vmatpush2.bf16.msra.mxu0 %v1298_v15  ;;  %v1580_v15 = vld [vmem:[#allocation2 + $0xa8] sm:$0xff]  ;;  %v1273_v1 = vcombine.high %v216_v51, %v218_v59 }
  0x38   :  { %971 = vmatpush2.bf16.msra.mxu1 %v1346_v19  ;;  %893 = vmatprep.subr.bf16.mxu0 %v1295_v20  ;;  %2054 = vst [vmem:[#allocation18_spill] sm:$0xff] %v1580_v15  ;;  %v227_v19 = vunpack.c.l.s8.bf16 %v1578_v61  ;;  %v229_v0 = vunpack.c.l.s8.bf16 %v1580_v15  ;;  %v1586_v20 = vld [vmem:[#allocation2 + $0x98] sm:$0xff] }
  0x39   :  { %972 = vmatprep.subr.bf16.mxu1 %v1343_v38  ;;  %v1584_v38 = vld [vmem:[#allocation2 + $0x90] sm:$0xff]  ;;  %2056 = vst [vmem:[#allocation20_spill] sm:$0xff] %v1586_v20  ;;  %v225_v37 = vunpack.c.l.s8.bf16 %v1586_v20 }
  0x3a   :  { %2055 = vst [vmem:[#allocation19_spill] sm:$0xff] %v1584_v38  ;;  %v1283_v23 = vcombine.high %v227_v19, %v229_v0  ;;  %v223_v4 = vunpack.c.l.s8.bf16 %v1584_v38  ;;  %v1282_v42 = vcombine.low %v227_v19, %v229_v0  ;;  %v46_v19 = vld [vmem:[%s2017_s1 + $0x38] sm:$0xff]  ;;  %v2065_v38 = vunpack.c.h.s8.bf16 %v1434_v6 }
  0x3b   :  { %894 = vmatpush2.bf16.msra.mxu0 %v1294_v21  ;;  %v280_v21 = vunpack.c.h.s8.bf16 %v1428_v2  ;;  %v45_v2 = vld [vmem:[%s2017_s1 + $0x30] sm:$0xff] }
  0x3c   :  { %973 = vmatpush2.bf16.msra.mxu1 %v1342_v25  ;;  %895 = vmatprep.subr.bf16.mxu0 %v1291_v34  ;;  %v282_v34 = vunpack.c.h.s8.bf16 %v1432_v5  ;;  %v1278_v50 = vcombine.low %v223_v4, %v225_v37  ;;  %v40_v25 = vld [vmem:[%s2017_s1 + $0x8] sm:$0xff]  ;;  %v2061_v5 = vsub.s32 2, %v1588_v39 }
  0x3d   :  { %974 = vmatprep.subr.bf16.mxu1 %v1339_v58  ;;  %v1594_v58 = vld [vmem:[#allocation2 + $0x88] sm:$0xff] }
  0x3e   :  { %2059 = vst [vmem:[#allocation23_spill] sm:$0xff] %v1594_v58 }
  0x3f   :  { %896 = vmatpush2.bf16.msra.mxu0 %v1290_v46  ;;  %v41_v46 = vld [vmem:[%s2017_s1 + $0x10] sm:$0xff] }
  0x40   :  { %975 = vmatpush2.bf16.msra.mxu1 %v1338_v52  ;;  %897 = vmatprep.subr.bf16.mxu0 %v1287_v53  ;;  %v1279_v52 = vcombine.high %v223_v4, %v225_v37  ;;  %v219_v53 = vunpack.c.l.s8.bf16 %v1592_v24  ;;  %v44_v24 = vld [vmem:[%s2017_s1 + $0x28] sm:$0xff]  ;;  %v39_v37 = vld [vmem:[%s2017_s1] sm:$0xff] }
  0x41   :  { %1015 = vmatprep.subr.bf16.mxu1 %v1273_v1  ;;  %v221_v1 = vunpack.c.l.s8.bf16 %v1594_v58  ;;  %v2060_v58 = vsub.s32 3, %v1588_v39 }
  0x43   :  { %898 = vmatpush2.bf16.msra.mxu0 %v1286_v22  ;;  %v42_v22 = vld [vmem:[%s2017_s1 + $0x18] sm:$0xff]  ;;  %v1370_v0 = vpop.eup %1369  ;;  %v1275_v61 = vcombine.high %v219_v53, %v221_v1  ;;  %v1274_v36 = vcombine.low %v219_v53, %v221_v1 }
  0x44   :  { %899 = vmatprep.subr.bf16.mxu0 %v1283_v23  ;;  %v1272_v23 = vcombine.low %v216_v51, %v218_v59  ;;  %v1624_v59 = vrot.slane %v1370_v0, %v2060_v58  ;;  %v1628_v51 = vrot.slane %v1370_v0, %v2061_v5  ;;  %v1635_v4 = vrot.slane %v1370_v0, %v2062_v43  ;;  %v43_v58 = vld [vmem:[%s2017_s1 + $0x20] sm:$0xff] }
  0x45   :  { %v2063_v5 = vsub.s32 0, %v1588_v39  ;;  %v210_v43 = vunpack.c.h.s8.bf16 %v1447_v16 }
  0x46   :  { %v91_v3 = vmul.f32 %v1624_v59, %v42_v22  ;;  %v95_v60 = vmul.f32 %v1624_v59, %v46_v19  ;;  %v90_v35 = vmul.f32 %v1628_v51, %v41_v46  ;;  %v94_v39 = vmul.f32 %v1628_v51, %v45_v2  ;;  %v48_v46 = vld [vmem:[%s2017_s1 + $0x48] sm:$0xff] }
  0x47   :  { %900 = vmatpush2.bf16.msra.mxu0 %v1282_v42  ;;  %v1645_v20 = vrot.slane %v1370_v0, %v2063_v5  ;;  %v2064_v42 = vunpack.c.h.s8.bf16 %v1436_v7  ;;  %v50_v0 = vld [vmem:[%s2017_s1 + $0x58] sm:$0xff]  ;;  %v93_v53 = vmul.f32 %v1635_v4, %v44_v24  ;;  %v52_v19 = vld [vmem:[%s2017_s1 + $0x68] sm:$0xff]  ;;  %v276_v24 = vunpack.c.h.s8.bf16 %v1440_v10 }
  0x48   :  { %901 = vmatprep.subr.bf16.mxu0 %v1279_v52  ;;  %v89_v52 = vmul.f32 %v1635_v4, %v40_v25  ;;  %v1672_v2 = vpack.c.bf16 %v95_v60, %v91_v3  ;;  %v1674_v5 = vpack.c.bf16 %v94_v39, %v90_v35  ;;  %v1337_v25 = vcombine.high %v280_v21, %v282_v34 }
  0x49   :  { %v1269_v15 = vcombine.high %v2065_v38, %v2064_v42  ;;  %v54_v38 = vld [vmem:[%s2017_s1 + $0x78] sm:$0xff]  ;;  %v88_v1 = vmul.f32 %v1645_v20, %v39_v37  ;;  %v92_v22 = vmul.f32 %v1645_v20, %v43_v58  ;;  %v49_v37 = vld [vmem:[%s2017_s1 + $0x50] sm:$0xff]  ;;  %v278_v3 = vunpack.c.h.s8.bf16 %v1442_v11 }
  0x4a   :  { %v53_v58 = vld [vmem:[%s2017_s1 + $0x70] sm:$0xff]  ;;  %v1683_v42 = vpack.c.bf16 %v93_v53, %v89_v52  ;;  %v99_v35 = vmul.f32 %v1624_v59, %v50_v0  ;;  %v103_v60 = vmul.f32 %v1624_v59, %v54_v38  ;;  %1355 = vmatprep.mubr.msk.bf16.mxu1 %vm847_vm1, %v1672_v2  ;;  %v97_v39 = vmul.f32 %v1635_v4, %v48_v46  ;;  %v58_v38 = vld [vmem:[%s2017_s1 + $0x98] sm:$0xff] }
  0x4b   :  { %902 = vmatpush2.bf16.msra.mxu0 %v1278_v50  ;;  %v1690_v10 = vpack.c.bf16 %v92_v22, %v88_v1  ;;  %v101_v50 = vmul.f32 %v1635_v4, %v52_v19  ;;  %977 = vmatmul.mubr.bf16.vlgmr.msra.gmra.mxu1 %v1674_v5  ;;  %v98_v11 = vmul.f32 %v1628_v51, %v49_v37  ;;  %v62_v52 = vld [vmem:[%s2017_s1 + $0xb8] sm:$0xff]  ;;  %v2066_v1 = vunpack.c.h.s8.bf16 %v1436_v7 }
  0x4c   :  { %903 = vmatprep.subr.bf16.mxu0 %v1275_v61  ;;  %905 = vmatprep.mubr.bf16.mxu0 %v1683_v42  ;;  %v1696_v61 = vpack.c.bf16 %v103_v60, %v99_v35  ;;  %v102_v0 = vmul.f32 %v1628_v51, %v53_v58  ;;  %v1336_v53 = vcombine.low %v280_v21, %v282_v34  ;;  %v2067_v22 = vunpack.c.h.s8.bf16 %v1434_v6  ;;  %v47_v35 = vld [vmem:[%s2017_s1 + $0x40] sm:$0xff] }
  0x4d   :  { %1016 = vmatpush1.bf16.msra.mxu1 %v1272_v23  ;;  %v2068_v19 = vunpack.c.h.s8.bf16 %v1444_v12  ;;  %v204_v58 = vunpack.c.h.s8.bf16 %v1458_v26  ;;  %v51_v21 = vld [vmem:[%s2017_s1 + $0x60] sm:$0xff]  ;;  %v206_v6 = vunpack.c.h.s8.bf16 %v1460_v27  ;;  %v1333_v7 = vcombine.high %v276_v24, %v278_v3 }
  0x4e   :  { %v1268_v46 = vcombine.low %v2067_v22, %v2066_v1  ;;  %1017 = vmatprep.subr.bf16.mxu1 %v1269_v15  ;;  %v272_v34 = vunpack.c.h.s8.bf16 %v1449_v17  ;;  %v274_v23 = vunpack.c.h.s8.bf16 %v1451_v18  ;;  %v1724_v60 = vpack.c.bf16 %v101_v50, %v97_v39  ;;  %1356 = vmatprep.mubr.msk.bf16.mxu1 %vm847_vm1, %v1696_v61  ;;  %v56_v17 = vld [vmem:[%s2017_s1 + $0x88] sm:$0xff]  ;;  %v61_v1 = vld [vmem:[%s2017_s1 + $0xb0] sm:$0xff] }
  0x4f   :  { %v1265_v37 = vcombine.high %v2068_v19, %v210_v43  ;;  %904 = vmatpush2.bf16.msra.mxu0 %v1274_v36  ;;  %v107_v26 = vmul.f32 %v1624_v59, %v58_v38  ;;  %v111_v36 = vmul.f32 %v1624_v59, %v62_v52  ;;  %v96_v15 = vmul.f32 %v1645_v20, %v47_v35  ;;  %v60_v18 = vld [vmem:[%s2017_s1 + $0xa8] sm:$0xff] }
  0x50   :  { %1086 = vmatprep.subr.bf16.mxu0 %v1337_v25  ;;  %v100_v27 = vmul.f32 %v1645_v20, %v51_v21  ;;  %v1733_v25 = vpack.c.bf16 %v102_v0, %v98_v11  ;;  %v2069_v39 = vmov %v2068_v19  ;;  %v200_v38 = vunpack.c.h.s8.bf16 %v1470_v40  ;;  %v57_v0 = vld [vmem:[%s2017_s1 + $0x90] sm:$0xff]  ;;  %v55_v21 = vld [vmem:[%s2017_s1 + $0x80] sm:$0xff] }
  0x51   :  { %1018 = vmatpush1.bf16.msra.mxu1 %v1268_v46  ;;  %v1264_v50 = vcombine.low %v2069_v39, %v210_v43  ;;  %v202_v52 = vunpack.c.h.s8.bf16 %v1472_v41  ;;  %v1332_v11 = vcombine.low %v276_v24, %v278_v3  ;;  %v1261_v22 = vcombine.high %v204_v58, %v206_v6 }
  0x52   :  { %906 = vmatmul.mubr.bf16.vlgmr.msra.gmra.mxu0 %v1690_v10  ;;  %1019 = vmatprep.subr.bf16.mxu1 %v1265_v37  ;;  %v1329_v16 = vcombine.high %v272_v34, %v274_v23  ;;  %v268_v12 = vunpack.c.h.s8.bf16 %v1464_v32  ;;  %v270_v40 = vunpack.c.h.s8.bf16 %v1466_v33  ;;  %v105_v41 = vmul.f32 %v1635_v4, %v56_v17  ;;  %v66_v32 = vld [vmem:[%s2017_s1 + $0xd8] sm:$0x1] }
  0x53   :  { %1087 = vmatpush1.bf16.msra.mxu0 %v1336_v53  ;;  %915 = vmatprep.mubr.bf16.mxu0 %v1724_v60  ;;  %v109_v43 = vmul.f32 %v1635_v4, %v60_v18  ;;  %v1758_v24 = vpack.c.bf16 %v111_v36, %v107_v26  ;;  %v1760_v3 = vpack.c.bf16 %v100_v27, %v96_v15  ;;  %v196_v19 = vunpack.c.h.s8.bf16 %v1484_v54 }
  0x54   :  { %1088 = vmatprep.subr.bf16.mxu0 %v1333_v7  ;;  %987 = vmatmul.mubr.bf16.gmra.mxu1 %v1733_v25  ;;  %v106_v53 = vmul.f32 %v1628_v51, %v57_v0  ;;  %v110_v46 = vmul.f32 %v1628_v51, %v61_v1  ;;  %v1260_v33 = vcombine.low %v204_v58, %v206_v6  ;;  %v198_v37 = vunpack.c.h.s8.bf16 %v1486_v55  ;;  %v59_v7 = vld [vmem:[%s2017_s1 + $0xa0] sm:$0xff] }
  0x55   :  { %1020 = vmatpush1.bf16.msra.mxu1 %v1264_v50  ;;  %v1328_v35 = vcombine.low %v272_v34, %v274_v23  ;;  %v1257_v26 = vcombine.high %v200_v38, %v202_v52  ;;  %v1325_v36 = vcombine.high %v268_v12, %v270_v40  ;;  %v264_v58 = vunpack.c.h.s8.bf16 %v1476_v44  ;;  %1357 = vmatprep.mubr.msk.bf16.mxu1 %vm847_vm1, %v1758_v24  ;;  %v64_v44 = vld [vmem:[%s2017_s1 + $0xc8] sm:$0x1] }
  0x56   :  { %1021 = vmatprep.subr.bf16.mxu1 %v1261_v22  ;;  %v266_v54 = vunpack.c.h.s8.bf16 %v1478_v45  ;;  %v1778_v6 = vpack.c.bf16 %v109_v43, %v105_v41  ;;  %v115_v55 = vmul.f32 %v1624_v59, %v66_v32  ;;  %v104_v34 = vmul.f32 %v1645_v20, %v55_v21  ;;  %v65_v59 = vld [vmem:[%s2017_s1 + $0xd0] sm:$0x1] }
  0x57   :  { %1089 = vmatpush1.bf16.msra.mxu0 %v1332_v11  ;;  %v108_v23 = vmul.f32 %v1645_v20, %v59_v7  ;;  %v1786_v15 = vpack.c.bf16 %v110_v46, %v106_v53  ;;  %v1256_v45 = vcombine.low %v200_v38, %v202_v52  ;;  %v1253_v27 = vcombine.high %v196_v19, %v198_v37 }
  0x58   :  { %1090 = vmatprep.subr.bf16.mxu0 %v1329_v16  ;;  %v192_v17 = vunpack.c.h.s8.bf16 %v1496_v8  ;;  %v1324_v18 = vcombine.low %v268_v12, %v270_v40  ;;  %v194_v39 = vunpack.c.h.s8.bf16 %v1498_v9  ;;  %v1321_v50 = vcombine.high %v264_v58, %v266_v54 }
  0x59   :  { %1022 = vmatpush1.bf16.msra.mxu1 %v1260_v33  ;;  %v260_v11 = vunpack.c.h.s8.bf16 %v1488_v56  ;;  %v262_v0 = vunpack.c.h.s8.bf16 %v1490_v57  ;;  %v113_v38 = vmul.f32 %v1635_v4, %v64_v44  ;;  %v1800_v8 = vpack.c.bf16 %v115_v55, %v115_v55  ;;  %v63_v4 = vld [vmem:[%s2017_s1 + $0xc0] sm:$0x1] }
  0x5a   :  { %916 = vmatmul.mubr.bf16.gmra.mxu0 %v1760_v3  ;;  %1023 = vmatprep.subr.bf16.mxu1 %v1257_v26  ;;  %v1802_v52 = vpack.c.bf16 %v108_v23, %v104_v34  ;;  %v114_v1 = vmul.f32 %v1628_v51, %v65_v59  ;;  %v1252_v9 = vcombine.low %v196_v19, %v198_v37  ;;  %v188_v22 = vunpack.c.h.s8.bf16 %v1508_v28  ;;  %v2072_v23 = vld [vmem:[#allocation5_spill] sm:$0xff]  ;;  %v2075_v59 = vld [vmem:[#allocation12_spill] sm:$0xff] }
  0x5b   :  { %1091 = vmatpush1.bf16.msra.mxu0 %v1328_v35  ;;  %925 = vmatprep.mubr.bf16.mxu0 %v1778_v6  ;;  %v190_v56 = vunpack.c.h.s8.bf16 %v1510_v29  ;;  %v1320_v57 = vcombine.low %v264_v58, %v266_v54  ;;  %v1249_v16 = vcombine.high %v192_v17, %v194_v39  ;;  %v1317_v12 = vcombine.high %v260_v11, %v262_v0 }
  0x5c   :  { %1092 = vmatprep.subr.bf16.mxu0 %v1325_v36  ;;  %997 = vmatmul.mubr.bf16.gmra.mxu1 %v1786_v15  ;;  %v256_v40 = vunpack.c.h.s8.bf16 %v1500_v13  ;;  %v258_v51 = vunpack.c.h.s8.bf16 %v1502_v14  ;;  %v1813_v41 = vpack.c.bf16 %v113_v38, %v113_v38  ;;  %v112_v28 = vmul.f32 %v1645_v20, %v63_v4  ;;  %v2070_v36 = vld [vmem:[#allocation7_spill] sm:$0xff] }
  0x5d   :  { %1024 = vmatpush1.bf16.msra.mxu1 %v1256_v45  ;;  %1358 = vmatprep.mubr.msk.bf16.mxu1 %vm847_vm1, %v1800_v8  ;;  %v1819_v29 = vpack.c.bf16 %v114_v1, %v114_v1  ;;  %v1248_v43 = vcombine.low %v192_v17, %v194_v39  ;;  %v1245_v53 = vcombine.high %v188_v22, %v190_v56  ;;  %v248_v46 = vunpack.c.h.s8.bf16 %v1523_v47  ;;  %v2074_v17 = vld [vmem:[#allocation11_spill] sm:$0xff]  ;;  %v2077_v1 = vld [vmem:[#allocation10_spill] sm:$0xff] }
  0x5e   :  { %1025 = vmatprep.subr.bf16.mxu1 %v1253_v27  ;;  %v1316_v13 = vcombine.low %v260_v11, %v262_v0  ;;  %v250_v14 = vunpack.c.h.s8.bf16 %v1525_v48  ;;  %v1313_v32 = vcombine.high %v256_v40, %v258_v51  ;;  %v252_v33 = vunpack.c.h.s8.bf16 %v1512_v30  ;;  %v2076_v0 = vld [vmem:[#allocation9_spill] sm:$0xff] }
  0x5f   :  { %1093 = vmatpush1.bf16.msra.mxu0 %v1324_v18  ;;  %v254_v19 = vunpack.c.h.s8.bf16 %v1514_v31  ;;  %v1826_v20 = vpack.c.bf16 %v112_v28, %v112_v28  ;;  %v1244_v37 = vcombine.low %v188_v22, %v190_v56  ;;  %v244_v47 = vunpack.c.h.s8.bf16 %v1532_v62  ;;  %v2071_v62 = vld [vmem:[#allocation8_spill] sm:$0xff]  ;;  %v2078_v56 = vld [vmem:[#allocation15_spill] sm:$0xff] }
  0x60   :  { %1094 = vmatprep.subr.bf16.mxu0 %v1321_v50  ;;  %v246_v35 = vunpack.c.h.s8.bf16 %v1534_v63  ;;  %v1312_v48 = vcombine.low %v256_v40, %v258_v51  ;;  %v1305_v21 = vcombine.high %v248_v46, %v250_v14  ;;  %v296_v31 = vunpack.c.h.s8.bf16 %v1527_v49  ;;  %v2073_v49 = vld [vmem:[#allocation6_spill] sm:$0xff]  ;;  %v2080_v51 = vld [vmem:[#allocation13_spill] sm:$0xff] }
  0x61   :  { %1026 = vmatpush1.bf16.msra.mxu1 %v1252_v9  ;;  %v1309_v30 = vcombine.high %v252_v33, %v254_v19  ;;  %v1304_v7 = vcombine.low %v248_v46, %v250_v14  ;;  %v240_v58 = vunpack.c.h.s8.bf16 %v2070_v36  ;;  %v242_v54 = vunpack.c.h.s8.bf16 %v2071_v62  ;;  %v2086_v62 = vld [vmem:[#allocation22_spill] sm:$0xff] }
  0x62   :  { %926 = vmatmul.mubr.bf16.gmra.mxu0 %v1802_v52  ;;  %1027 = vmatprep.subr.bf16.mxu1 %v1249_v16  ;;  %v1301_v26 = vcombine.high %v244_v47, %v246_v35  ;;  %v1308_v63 = vcombine.low %v252_v33, %v254_v19  ;;  %v1353_v55 = vcombine.high %v296_v31, %v296_v31  ;;  %v292_v44 = vunpack.c.h.s8.bf16 %v2072_v23  ;;  %v2079_v16 = vld [vmem:[#allocation16_spill] sm:$0xff]  ;;  %v2083_v19 = vld [vmem:[#allocation18_spill] sm:$0xff] }
  0x63   :  { %1095 = vmatpush1.bf16.msra.mxu0 %v1320_v57  ;;  %935 = vmatprep.mubr.bf16.mxu0 %v1813_v41  ;;  %v1352_v34 = vcombine.low %v296_v31, %v296_v31  ;;  %v294_v45 = vunpack.c.h.s8.bf16 %v2073_v49  ;;  %v1297_v27 = vcombine.high %v240_v58, %v242_v54  ;;  %v236_v18 = vunpack.c.h.s8.bf16 %v2074_v17 }
  0x64   :  { %1096 = vmatprep.subr.bf16.mxu0 %v1317_v12  ;;  %1007 = vmatmul.mubr.bf16.gmra.mxu1 %v1819_v29  ;;  %v238_v39 = vunpack.c.h.s8.bf16 %v2075_v59  ;;  %v288_v38 = vunpack.c.h.s8.bf16 %v2076_v0  ;;  %v290_v9 = vunpack.c.h.s8.bf16 %v2077_v1  ;;  %v232_v57 = vunpack.c.h.s8.bf16 %v2078_v56 }
  0x65   :  { %1028 = vmatpush1.bf16.msra.mxu1 %v1248_v43  ;;  %1047 = vmatprep.mubr.bf16.mxu1 %v1683_v42  ;;  %v1300_v42 = vcombine.low %v244_v47, %v246_v35  ;;  %v868_v50 = vsel %vm860_vm0, %v1352_v34, 0  ;;  %v1349_v11 = vcombine.high %v292_v44, %v294_v45  ;;  %v1348_v4 = vcombine.low %v292_v44, %v294_v45  ;;  %v2081_v43 = vld [vmem:[#allocation14_spill] sm:$0xff] }
  0x66   :  { %1029 = vmatprep.subr.bf16.mxu1 %v1245_v53  ;;  %v1293_v22 = vcombine.high %v236_v18, %v238_v39  ;;  %v234_v12 = vunpack.c.h.s8.bf16 %v2079_v16  ;;  %v1345_v40 = vcombine.high %v288_v38, %v290_v9  ;;  %v284_v28 = vunpack.c.h.s8.bf16 %v2080_v51 }
  0x67   :  { %1097 = vmatpush1.bf16.msra.mxu0 %v1316_v13  ;;  %v286_v53 = vunpack.c.h.s8.bf16 %v2081_v43  ;;  %v1292_v46 = vcombine.low %v236_v18, %v238_v39  ;;  %v1344_v13 = vcombine.low %v288_v38, %v290_v9 }
  0x68   :  { %1098 = vmatprep.subr.bf16.mxu0 %v1313_v32  ;;  %v1289_v14 = vcombine.high %v232_v57, %v234_v12  ;;  %v2082_v32 = vld [vmem:[#allocation17_spill] sm:$0xff]  ;;  %v1288_v35 = vcombine.low %v232_v57, %v234_v12 }
  0x69   :  { %1030 = vmatpush1.bf16.msra.mxu1 %v1244_v37  ;;  %v228_v33 = vunpack.c.h.s8.bf16 %v2082_v32  ;;  %v230_v37 = vunpack.c.h.s8.bf16 %v2083_v19  ;;  %v1341_v47 = vcombine.high %v284_v28, %v286_v53 }
  0x6a   :  { %936 = vmatmul.mubr.bf16.gmra.mxu0 %v1826_v20  ;;  %1031 = vmatprep.subr.bf16.mxu1 %v1305_v21 }
  0x6b   :  { %1099 = vmatpush1.bf16.msra.mxu0 %v1312_v48  ;;  %1360 = vmatprep.mubr.msk.bf16.mxu0 %vm847_vm1, %v1672_v2  ;;  %v1296_v2 = vcombine.low %v240_v58, %v242_v54  ;;  %v1340_v48 = vcombine.low %v284_v28, %v286_v53  ;;  %v1285_v21 = vcombine.high %v228_v33, %v230_v37  ;;  %v220_v54 = vunpack.c.h.s8.bf16 %v2086_v62 }
  0x6c   :  { %1100 = vmatprep.subr.bf16.mxu0 %v1309_v30  ;;  %v2084_v30 = vld [vmem:[#allocation19_spill] sm:$0xff]  ;;  %v1284_v36 = vcombine.low %v228_v33, %v230_v37 }
  0x6d   :  { %1032 = vmatpush2.bf16.msra.mxu1 %v1304_v7  ;;  %v224_v31 = vunpack.c.h.s8.bf16 %v2084_v30  ;;  %v2085_v7 = vld [vmem:[#allocation20_spill] sm:$0xff] }
  0x6e   :  { %1033 = vmatprep.subr.bf16.mxu1 %v1301_v26  ;;  %v226_v26 = vunpack.c.h.s8.bf16 %v2085_v7 }
  0x6f   :  { %1101 = vmatpush1.bf16.msra.mxu0 %v1308_v63  ;;  %v2087_v63 = vld [vmem:[#allocation23_spill] sm:$0xff] }
  0x70   :  { %1359 = vmatprep.subr.msk.bf16.mxu0 %vm860_vm0, %v1353_v55  ;;  %v1281_v58 = vcombine.high %v224_v31, %v226_v26  ;;  %v222_v55 = vunpack.c.h.s8.bf16 %v2087_v63  ;;  %v1280_v34 = vcombine.low %v224_v31, %v226_v26 }
  0x71   :  { %1034 = vmatpush2.bf16.msra.mxu1 %v1300_v42 }
  0x72   :  { %1035 = vmatprep.subr.bf16.mxu1 %v1297_v27  ;;  %v1277_v23 = vcombine.high %v220_v54, %v222_v55  ;;  %v1276_v44 = vcombine.low %v220_v54, %v222_v55 }
  0x73   :  { %1111 = vmatpush2.bf16.msra.mxu0 %v868_v50 }
  0x74   :  { %1112 = vmatprep.subr.bf16.mxu0 %v1349_v11 }
  0x75   :  { %1036 = vmatpush2.bf16.msra.mxu1 %v1296_v2 }
  0x76   :  { %1037 = vmatprep.subr.bf16.mxu1 %v1293_v22 }
  0x77   :  { %1113 = vmatpush2.bf16.msra.mxu0 %v1348_v4 }
  0x78   :  { %1114 = vmatprep.subr.bf16.mxu0 %v1345_v40 }
  0x79   :  { %1038 = vmatpush2.bf16.msra.mxu1 %v1292_v46 }
  0x7a   :  { %1039 = vmatprep.subr.bf16.mxu1 %v1289_v14 }
  0x7b   :  { %1115 = vmatpush2.bf16.msra.mxu0 %v1344_v13 }
  0x7c   :  { %1116 = vmatprep.subr.bf16.mxu0 %v1341_v47 }
  0x7d   :  { %1040 = vmatpush2.bf16.msra.mxu1 %v1288_v35 }
  0x7e   :  { %1041 = vmatprep.subr.bf16.mxu1 %v1285_v21 }
  0x7f   :  { %1117 = vmatpush2.bf16.msra.mxu0 %v1340_v48 }
  0x81   :  { %1042 = vmatpush2.bf16.msra.mxu1 %v1284_v36 }
  0x82   :  { %1119 = vmatmul.mubr.bf16.vlgmr.msra.gmra.mxu0 %v1674_v5  ;;  %1043 = vmatprep.subr.bf16.mxu1 %v1281_v58 }
  0x83   :  { %1361 = vmatprep.mubr.msk.bf16.mxu0 %vm847_vm1, %v1696_v61 }
  0x85   :  { %1044 = vmatpush2.bf16.msra.mxu1 %v1280_v34 }
  0x86   :  { %1045 = vmatprep.subr.bf16.mxu1 %v1277_v23 }
  0x89   :  { %1046 = vmatpush2.bf16.msra.mxu1 %v1276_v44 }
  0x8a   :  { %1129 = vmatmul.mubr.bf16.gmra.mxu0 %v1733_v25 }
  0x8b   :  { %1362 = vmatprep.mubr.msk.bf16.mxu0 %vm847_vm1, %v1758_v24 }
  0x8c   :  { %1048 = vmatmul.mubr.bf16.vlgmr.msra.gmra.mxu1 %v1690_v10  ;;  %v1876_v10 = vld [vmem:[%s2019_s3] sm:$0xf] }
  0x8d   :  { %1057 = vmatprep.mubr.bf16.mxu1 %v1724_v60  ;;  %v2088_v60 = vld [vmem:[#allocation21_spill] sm:$0xff] }
  0x8e   :  { %v2089_v25 = vsub.s32 0, %v2088_v60 }
  0x90   :  { %v1881_v24 = vrot.slane %v1876_v10, %v2089_v25 }
  0x92   :  { %1139 = vmatmul.mubr.bf16.gmra.mxu0 %v1786_v15 }
  0x93   :  { %1363 = vmatprep.mubr.msk.bf16.mxu0 %vm847_vm1, %v1800_v8  ;;  %v2090_v8 = vsub.s32 1, %v2088_v60 }
  0x94   :  { %1058 = vmatmul.mubr.bf16.gmra.mxu1 %v1760_v3 }
  0x95   :  { %1067 = vmatprep.mubr.bf16.mxu1 %v1778_v6 }
  0x9a   :  { %1149 = vmatmul.mubr.bf16.gmra.mxu0 %v1819_v29 }
  0x9c   :  { %1068 = vmatmul.mubr.bf16.gmra.mxu1 %v1802_v52  ;;  %v1886_v52 = vrot.slane %v1876_v10, %v2090_v8 }
  0x9d   :  { %1077 = vmatprep.mubr.bf16.mxu1 %v1813_v41 }
  0xa4   :  { %1078 = vmatmul.mubr.bf16.gmra.mxu1 %v1826_v20 }
 0x10b   :  { %v978_v5 = vpop.f32.mrf.mxu1 }
 0x10d   :  { %v980_v61 = vpop.f32.mrf.mxu1 }
 0x10f   :  { %v982_v3 = vpop.f32.mrf.mxu1 }
 0x111   :  { %v984_v41 = vpop.f32.mrf.mxu1 }
 0x112   :  { %v907_v6 = vpop.f32.mrf.mxu0 }
 0x113   :  { %v979_v15 = vadd.f32 %v978_v5, %v907_v6 }
 0x114   :  { %v909_v29 = vpop.f32.mrf.mxu0  ;;  %v988_v42 = vpop.f32.mrf.mxu1 }
 0x115   :  { %v1179_v20 = vmul.f32 %v1881_v24, %v979_v15  ;;  %v981_v49 = vadd.f32 %v980_v61, %v909_v29 }
 0x116   :  { %v911_v45 = vpop.f32.mrf.mxu0  ;;  %v990_v59 = vpop.f32.mrf.mxu1 }
 0x117   :  { %1207 = vst [vmem:[%s2020_s4] sm:$0xff] %v1179_v20  ;;  %v1180_v27 = vmul.f32 %v1886_v52, %v981_v49  ;;  %v983_v17 = vadd.f32 %v982_v3, %v911_v45 }
 0x118   :  { %v913_v18 = vpop.f32.mrf.mxu0  ;;  %v992_v0 = vpop.f32.mrf.mxu1 }
 0x119   :  { %1208 = vst [vmem:[%s2020_s4 + $0x8] sm:$0xff] %v1180_v27  ;;  %v1183_v39 = vmul.f32 %v1881_v24, %v983_v17  ;;  %v985_v50 = vadd.f32 %v984_v41, %v913_v18 }
 0x11a   :  { %v917_v11 = vpop.f32.mrf.mxu0  ;;  %v994_v2 = vpop.f32.mrf.mxu1 }
 0x11b   :  { %1211 = vst [vmem:[%s2020_s4 + $0x20] sm:$0xff] %v1183_v39  ;;  %v1184_v38 = vmul.f32 %v1886_v52, %v985_v50  ;;  %v989_v1 = vadd.f32 %v988_v42, %v917_v11 }
 0x11c   :  { %v919_v9 = vpop.f32.mrf.mxu0  ;;  %v998_v4 = vpop.f32.mrf.mxu1 }
 0x11d   :  { %1212 = vst [vmem:[%s2020_s4 + $0x28] sm:$0xff] %v1184_v38  ;;  %v1187_v22 = vmul.f32 %v1881_v24, %v989_v1  ;;  %v991_v56 = vadd.f32 %v990_v59, %v919_v9 }
 0x11e   :  { %v921_v57 = vpop.f32.mrf.mxu0  ;;  %v1000_v51 = vpop.f32.mrf.mxu1 }
 0x11f   :  { %1215 = vst [vmem:[%s2020_s4 + $0x40] sm:$0xff] %v1187_v22  ;;  %v1188_v16 = vmul.f32 %v1886_v52, %v991_v56  ;;  %v993_v12 = vadd.f32 %v992_v0, %v921_v57 }
 0x120   :  { %v923_v40 = vpop.f32.mrf.mxu0  ;;  %v1002_v46 = vpop.f32.mrf.mxu1 }
 0x121   :  { %1216 = vst [vmem:[%s2020_s4 + $0x48] sm:$0xff] %v1188_v16  ;;  %v1191_v28 = vmul.f32 %v1881_v24, %v993_v12  ;;  %v995_v43 = vadd.f32 %v994_v2, %v923_v40 }
 0x122   :  { %v927_v53 = vpop.f32.mrf.mxu0  ;;  %v1004_v33 = vpop.f32.mrf.mxu1 }
 0x123   :  { %1219 = vst [vmem:[%s2020_s4 + $0x60] sm:$0xff] %v1191_v28  ;;  %v1192_v13 = vmul.f32 %v1886_v52, %v995_v43  ;;  %v999_v14 = vadd.f32 %v998_v4, %v927_v53 }
 0x124   :  { %v929_v32 = vpop.f32.mrf.mxu0  ;;  %v1008_v35 = vpop.f32.mrf.mxu1 }
 0x125   :  { %1220 = vst [vmem:[%s2020_s4 + $0x68] sm:$0xff] %v1192_v13  ;;  %v1195_v19 = vmul.f32 %v1881_v24, %v999_v14  ;;  %v1001_v37 = vadd.f32 %v1000_v51, %v929_v32 }
 0x126   :  { %v931_v47 = vpop.f32.mrf.mxu0  ;;  %v1010_v31 = vpop.f32.mrf.mxu1 }
 0x127   :  { %1223 = vst [vmem:[%s2020_s4 + $0x80] sm:$0xff] %v1195_v19  ;;  %v1196_v48 = vmul.f32 %v1886_v52, %v1001_v37  ;;  %v1003_v21 = vadd.f32 %v1002_v46, %v931_v47 }
 0x128   :  { %v933_v30 = vpop.f32.mrf.mxu0  ;;  %v1012_v58 = vpop.f32.mrf.mxu1 }
 0x129   :  { %1224 = vst [vmem:[%s2020_s4 + $0x88] sm:$0xff] %v1196_v48  ;;  %v1199_v7 = vmul.f32 %v1881_v24, %v1003_v21  ;;  %v1005_v26 = vadd.f32 %v1004_v33, %v933_v30 }
 0x12a   :  { %v937_v36 = vpop.f32.mrf.mxu0  ;;  %v1013_v55 = vpop.f32.mrf.mxu1 }
 0x12b   :  { %1227 = vst [vmem:[%s2020_s4 + $0xa0] sm:$0xff] %v1199_v7  ;;  %v1200_v62 = vmul.f32 %v1886_v52, %v1005_v26  ;;  %v1009_v54 = vadd.f32 %v1008_v35, %v937_v36 }
 0x12c   :  { %v939_v63 = vpop.f32.mrf.mxu0 }
 0x12d   :  { %1228 = vst [vmem:[%s2020_s4 + $0xa8] sm:$0xff] %v1200_v62  ;;  %v1203_v34 = vmul.f32 %v1881_v24, %v1009_v54  ;;  %v1011_v23 = vadd.f32 %v1010_v31, %v939_v63  ;;  %v2091_v24 = vsub.s32 2, %v2088_v60 }
 0x12e   :  { %v941_v44 = vpop.f32.mrf.mxu0 }
 0x12f   :  { %1231 = vst [vmem:[%s2020_s4 + $0xc0] sm:$0x1] %v1203_v34  ;;  %v1204_v5 = vmul.f32 %v1886_v52, %v1011_v23  ;;  %v1947_v29 = vrot.slane %v1876_v10, %v2091_v24  ;;  %v2092_v52 = vsub.s32 3, %v2088_v60 }
 0x130   :  { %v942_v61 = vpop.f32.mrf.mxu0 }
 0x131   :  { %1232 = vst [vmem:[%s2020_s4 + $0xc8] sm:$0x1] %v1204_v5  ;;  %v1952_v42 = vrot.slane %v1876_v10, %v2092_v52 }
 0x142   :  { %v1120_v25 = vpop.f32.mrf.mxu0 }
 0x144   :  { %v1122_v3 = vpop.f32.mrf.mxu0 }
 0x146   :  { %v1124_v6 = vpop.f32.mrf.mxu0 }
 0x148   :  { %v1126_v15 = vpop.f32.mrf.mxu0 }
 0x14a   :  { %v1130_v8 = vpop.f32.mrf.mxu0 }
 0x14c   :  { %v1132_v41 = vpop.f32.mrf.mxu0  ;;  %v1049_v20 = vpop.f32.mrf.mxu1 }
 0x14d   :  { %v1121_v45 = vadd.f32 %v1120_v25, %v1049_v20 }
 0x14e   :  { %v1134_v49 = vpop.f32.mrf.mxu0  ;;  %v1051_v27 = vpop.f32.mrf.mxu1 }
 0x14f   :  { %v1181_v18 = vmul.f32 %v1947_v29, %v1121_v45  ;;  %v1123_v59 = vadd.f32 %v1122_v3, %v1051_v27 }
 0x150   :  { %v1136_v17 = vpop.f32.mrf.mxu0  ;;  %v1053_v39 = vpop.f32.mrf.mxu1 }
 0x151   :  { %1209 = vst [vmem:[%s2020_s4 + $0x10] sm:$0xff] %v1181_v18  ;;  %v1182_v11 = vmul.f32 %v1952_v42, %v1123_v59  ;;  %v1125_v0 = vadd.f32 %v1124_v6, %v1053_v39 }
 0x152   :  { %v1140_v50 = vpop.f32.mrf.mxu0  ;;  %v1055_v38 = vpop.f32.mrf.mxu1 }
 0x153   :  { %1210 = vst.msk [vmem:[%s2020_s4 + $0x18] sm:$0xff] %vm847_vm1, %v1182_v11  ;;  %v1185_v10 = vmul.f32 %v1947_v29, %v1125_v0  ;;  %v1127_v60 = vadd.f32 %v1126_v15, %v1055_v38 }
 0x154   :  { %v1142_v1 = vpop.f32.mrf.mxu0  ;;  %v1059_v9 = vpop.f32.mrf.mxu1 }
 0x155   :  { %1213 = vst [vmem:[%s2020_s4 + $0x30] sm:$0xff] %v1185_v10  ;;  %v1186_v22 = vmul.f32 %v1952_v42, %v1127_v60  ;;  %v1131_v56 = vadd.f32 %v1130_v8, %v1059_v9 }
 0x156   :  { %v1144_v2 = vpop.f32.mrf.mxu0  ;;  %v1061_v57 = vpop.f32.mrf.mxu1 }
 0x157   :  { %1214 = vst.msk [vmem:[%s2020_s4 + $0x38] sm:$0xff] %vm847_vm1, %v1186_v22  ;;  %v1189_v16 = vmul.f32 %v1947_v29, %v1131_v56  ;;  %v1133_v12 = vadd.f32 %v1132_v41, %v1061_v57 }
 0x158   :  { %v1146_v4 = vpop.f32.mrf.mxu0  ;;  %v1063_v40 = vpop.f32.mrf.mxu1 }
 0x159   :  { %1217 = vst [vmem:[%s2020_s4 + $0x50] sm:$0xff] %v1189_v16  ;;  %v1190_v28 = vmul.f32 %v1952_v42, %v1133_v12  ;;  %v1135_v43 = vadd.f32 %v1134_v49, %v1063_v40 }
 0x15a   :  { %v1150_v51 = vpop.f32.mrf.mxu0  ;;  %v1065_v53 = vpop.f32.mrf.mxu1 }
 0x15b   :  { %1218 = vst.msk [vmem:[%s2020_s4 + $0x58] sm:$0xff] %vm847_vm1, %v1190_v28  ;;  %v1193_v13 = vmul.f32 %v1947_v29, %v1135_v43  ;;  %v1137_v14 = vadd.f32 %v1136_v17, %v1065_v53 }
 0x15c   :  { %v1152_v46 = vpop.f32.mrf.mxu0  ;;  %v1069_v32 = vpop.f32.mrf.mxu1 }
 0x15d   :  { %1221 = vst [vmem:[%s2020_s4 + $0x70] sm:$0xff] %v1193_v13  ;;  %v1194_v19 = vmul.f32 %v1952_v42, %v1137_v14  ;;  %v1141_v37 = vadd.f32 %v1140_v50, %v1069_v32 }
 0x15e   :  { %v1154_v33 = vpop.f32.mrf.mxu0  ;;  %v1071_v47 = vpop.f32.mrf.mxu1 }
 0x15f   :  { %1222 = vst.msk [vmem:[%s2020_s4 + $0x78] sm:$0xff] %vm847_vm1, %v1194_v19  ;;  %v1197_v48 = vmul.f32 %v1947_v29, %v1141_v37  ;;  %v1143_v21 = vadd.f32 %v1142_v1, %v1071_v47 }
 0x160   :  { %v1155_v35 = vpop.f32.mrf.mxu0  ;;  %v1073_v30 = vpop.f32.mrf.mxu1 }
 0x161   :  { %1225 = vst [vmem:[%s2020_s4 + $0x90] sm:$0xff] %v1197_v48  ;;  %v1198_v31 = vmul.f32 %v1952_v42, %v1143_v21  ;;  %v1145_v7 = vadd.f32 %v1144_v2, %v1073_v30 }
 0x162   :  { %v1075_v26 = vpop.f32.mrf.mxu1 }
 0x163   :  { %1226 = vst.msk [vmem:[%s2020_s4 + $0x98] sm:$0xff] %vm847_vm1, %v1198_v31  ;;  %v1201_v36 = vmul.f32 %v1947_v29, %v1145_v7  ;;  %v1147_v58 = vadd.f32 %v1146_v4, %v1075_v26 }
 0x164   :  { %v1079_v62 = vpop.f32.mrf.mxu1 }
 0x165   :  { %1229 = vst [vmem:[%s2020_s4 + $0xb0] sm:$0xff] %v1201_v36  ;;  %v1202_v54 = vmul.f32 %v1952_v42, %v1147_v58  ;;  %v1151_v63 = vadd.f32 %v1150_v51, %v1079_v62 }
 0x166   :  { %v1081_v55 = vpop.f32.mrf.mxu1 }
 0x167   :  { %1230 = vst.msk [vmem:[%s2020_s4 + $0xb8] sm:$0xff] %vm847_vm1, %v1202_v54  ;;  %v1205_v34 = vmul.f32 %v1947_v29, %v1151_v63  ;;  %v1153_v23 = vadd.f32 %v1152_v46, %v1081_v55 }
 0x168   :  { %v1083_v44 = vpop.f32.mrf.mxu1 }
 0x169   :  { %1233 = vst [vmem:[%s2020_s4 + $0xd0] sm:$0x1] %v1205_v34  ;;  %v1206_v5 = vmul.f32 %v1952_v42, %v1153_v23 }
 0x16a   :  { %v1084_v61 = vpop.f32.mrf.mxu1 }
 0x16b   :  { %1235 = vst.msk [vmem:[%s2020_s4 + $0xd8] sm:$0x1] %vm1234_vm2, %v1206_v5 }
 0x16c   :  { %1240 = vsyncpa [#allocation3], 1 }

</bundles_post_ra>
